<compile_context>
chip_gen: v7x
topology: tpu7x:2x2x1
jax: 0.10.0
libtpu: 0.0.40
codegen_flags: <defaults>
</compile_context>

<pallas_src>
import functools

import jax
import jax.numpy as jnp
from jax.experimental import pallas as pl
from jax.experimental.pallas import tpu as pltpu

LN_EPS = 1e-5  # PyTorch nn.LayerNorm default


def _round_up(x, m):
    return ((x + m - 1) // m) * m


def _layernorm(h, gamma, beta):
    # two-pass variance: matches PyTorch LayerNorm, avoids E[x^2]-E[x]^2 cancellation
    mu = jnp.mean(h, axis=-1, keepdims=True)
    d = h - mu
    var = jnp.mean(d * d, axis=-1, keepdims=True)
    return d * jax.lax.rsqrt(var + LN_EPS) * gamma + beta


def actor_critic_kernel(
    x_ref,        # (bb, state_dim) f32
    w1_ref,       # (state_dim, hidden) bf16
    p1_ref,       # (3, hidden) f32 = [b1; gamma1; beta1]
    w2_ref,       # (hidden, hidden) bf16
    p2_ref,       # (3, hidden) f32 = [b2; gamma2; beta2]
    wh_ref,       # (hidden, P) bf16  fused [wt | wd | wc | 0-pad], P mult of 128
    bh_ref,       # (1, P) f32        fused [bt | bd | bc | 0-pad]
    out_ref,      # (bb, P) f32       [tile_probs | dir_probs | value | 0-pad]
    *,
    num_tiles,
    num_dirs,
):
    p1 = p1_ref[...]
    p2 = p2_ref[...]

    # ---- shared trunk (actor and critic alias the same layers in PyTorch) ----
    # bf16 MXU operands, f32 accumulation.
    x = x_ref[...].astype(jnp.bfloat16)
    h = jnp.dot(x, w1_ref[...], preferred_element_type=jnp.float32) + p1[0:1, :]
    h = jnp.maximum(_layernorm(h, p1[1:2, :], p1[2:3, :]), 0.0)

    h = jnp.dot(h.astype(jnp.bfloat16), w2_ref[...],
                preferred_element_type=jnp.float32) + p2[0:1, :]
    h = jnp.maximum(_layernorm(h, p2[1:2, :], p2[2:3, :]), 0.0)

    # ---- fused heads: one MXU push -> lane-dense (bb, P) logits slab ----
    logits = jnp.dot(h.astype(jnp.bfloat16), wh_ref[...],
                     preferred_element_type=jnp.float32) + bh_ref[...]

    lane = jax.lax.broadcasted_iota(jnp.int32, logits.shape, 1)
    tile_mask = lane < num_tiles
    dir_mask = (lane >= num_tiles) & (lane < num_tiles + num_dirs)
    val_mask = lane == (num_tiles + num_dirs)

    # ---- fused segment softmaxes: a single exp pass over the whole slab ----
    tile_max = jnp.max(jnp.where(tile_mask, logits, -jnp.inf), -1, keepdims=True)
    dir_max = jnp.max(jnp.where(dir_mask, logits, -jnp.inf), -1, keepdims=True)
    m_vec = jnp.where(tile_mask, tile_max, jnp.where(dir_mask, dir_max, logits))
    e = jnp.exp(logits - m_vec)                    # value / pad lanes -> exp(0) = 1
    tile_sum = jnp.sum(jnp.where(tile_mask, e, 0.0), -1, keepdims=True)
    dir_sum = jnp.sum(jnp.where(dir_mask, e, 0.0), -1, keepdims=True)
    # exact normalization so probability rows sum to 1 at f32 precision
    scale = jnp.where(tile_mask, 1.0 / tile_sum,
                      jnp.where(dir_mask, 1.0 / dir_sum, 0.0))
    probs = e * scale                              # zero on value / pad lanes

    out_ref[...] = jnp.where(val_mask, logits, probs)


def actor_critic_forward(x, params, *, block_b=512):
    """x: (B, state_dim) float32. Returns (tile_probs, dir_probs, state_value)."""
    B, state_dim = x.shape
    hidden = params["w1"].shape[1]
    P = params["wh"].shape[1]
    num_tiles = params["num_tiles"]
    num_dirs = params["num_dirs"]

    rb = _round_up(B, 8)
    bb = min(block_b, rb)
    # Keep >= 2 grid steps whenever the batch allows it so v7x's two TensorCores
    # both get work (grid axis is marked "parallel").
    if rb // bb < 2 and rb >= 16:
        bb = _round_up((rb + 1) // 2, 8)
    padded_B = _round_up(B, bb)
    if padded_B != B:
        x = jnp.pad(x, ((0, padded_B - B), (0, 0)))

    kernel = functools.partial(
        actor_critic_kernel, num_tiles=num_tiles, num_dirs=num_dirs
    )

    out = pl.pallas_call(
        kernel,
        out_shape=jax.ShapeDtypeStruct((padded_B, P), jnp.float32),
        grid=(padded_B // bb,),
        in_specs=[
            pl.BlockSpec((bb, state_dim), lambda i: (i, 0)),
            pl.BlockSpec((state_dim, hidden), lambda i: (0, 0)),
            pl.BlockSpec((3, hidden), lambda i: (0, 0)),
            pl.BlockSpec((hidden, hidden), lambda i: (0, 0)),
            pl.BlockSpec((3, hidden), lambda i: (0, 0)),
            pl.BlockSpec((hidden, P), lambda i: (0, 0)),
            pl.BlockSpec((1, P), lambda i: (0, 0)),
        ],
        out_specs=pl.BlockSpec((bb, P), lambda i: (i, 0)),
        compiler_params=pltpu.CompilerParams(
            dimension_semantics=("parallel",),
        ),
    )(x, params["w1"], params["p1"], params["w2"], params["p2"],
      params["wh"], params["bh"])

    # Single batch trim, then cheap lane slices of the packed slab.  Callers that
    # can consume the packed (B, P) slab directly should do so to skip these.
    out = out[:B]
    tile_probs = out[:, :num_tiles]
    dir_probs = out[:, num_tiles:num_tiles + num_dirs]
    state_value = out[:, num_tiles + num_dirs:num_tiles + num_dirs + 1]
    return tile_probs, dir_probs, state_value


def init_params(key, state_dim, num_tiles, num_directions, hidden_units):
    """Shapes mirror the PyTorch module. Trunk Linears: xavier_uniform W, zero b.
    LayerNorm: gamma=1, beta=0. Heads: xavier_uniform (deterministic stand-in for
    PyTorch's default init). Weights pre-transposed to (in, out) and stored bf16
    for the MXU; accumulation stays f32."""
    ks = jax.random.split(key, 5)

    def xavier(k, fan_in, fan_out):
        bound = (6.0 / (fan_in + fan_out)) ** 0.5
        return jax.random.uniform(k, (fan_in, fan_out), jnp.float32, -bound, bound)

    total = num_tiles + num_directions + 1
    P = max(128, _round_up(total, 128))

    w1 = xavier(ks[0], state_dim, hidden_units).astype(jnp.bfloat16)
    w2 = xavier(ks[1], hidden_units, hidden_units).astype(jnp.bfloat16)
    wt = xavier(ks[2], hidden_units, num_tiles)
    wd = xavier(ks[3], hidden_units, num_directions)
    wc = xavier(ks[4], hidden_units, 1)

    # fused, zero-padded head weight/bias (padded lanes contribute nothing)
    wh = jnp.zeros((hidden_units, P), jnp.float32)
    wh = wh.at[:, :num_tiles].set(wt)
    wh = wh.at[:, num_tiles:num_tiles + num_directions].set(wd)
    wh = wh.at[:, num_tiles + num_directions:total].set(wc)
    wh = wh.astype(jnp.bfloat16)
    bh = jnp.zeros((1, P), jnp.float32)

    def stacked_ln_params():
        return jnp.stack([
            jnp.zeros((hidden_units,), jnp.float32),  # linear bias
            jnp.ones((hidden_units,), jnp.float32),   # LN gamma
            jnp.zeros((hidden_units,), jnp.float32),  # LN beta
        ], axis=0)

    return {
        "w1": w1, "p1": stacked_ln_params(),
        "w2": w2, "p2": stacked_ln_params(),
        "wh": wh, "bh": bh,
        "num_tiles": num_tiles, "num_dirs": num_directions,
    }


def reference_forward(x, p):
    """Pure-JAX reference (same bf16-operand / f32-accumulate contractions)."""
    nt, nd = p["num_tiles"], p["num_dirs"]

    def ln(h, g, b):
        mu = jnp.mean(h, -1, keepdims=True)
        d = h - mu
        var = jnp.mean(d * d, -1, keepdims=True)
        return d * jax.lax.rsqrt(var + LN_EPS) * g + b

    def mm(a, w):
        return jnp.dot(a.astype(jnp.bfloat16), w, preferred_element_type=jnp.float32)

    def softmax(z):
        z = z - jnp.max(z, -1, keepdims=True)
        e = jnp.exp(z)
        return e / jnp.sum(e, -1, keepdims=True)

    b1, g1, be1 = p["p1"][0], p["p1"][1], p["p1"][2]
    b2, g2, be2 = p["p2"][0], p["p2"][1], p["p2"][2]
    h = jnp.maximum(ln(mm(x, p["w1"]) + b1, g1, be1), 0.0)
    h = jnp.maximum(ln(mm(h, p["w2"]) + b2, g2, be2), 0.0)
    logits = mm(h, p["wh"]) + p["bh"]
    tile = softmax(logits[:, :nt])
    dirs = softmax(logits[:, nt:nt + nd])
    val = logits[:, nt + nd:nt + nd + 1]
    return tile, dirs, val


if __name__ == "__main__":
    # small shapes consistent with the module (hidden_units keeps its default 128)
    B, state_dim, hidden_units = 8, 32, 128
    num_tiles, num_directions = 16, 4

    key = jax.random.PRNGKey(0)
    kx, kp = jax.random.split(key)
    x = jax.random.normal(kx, (B, state_dim), jnp.float32)
    params = init_params(kp, state_dim, num_tiles, num_directions, hidden_units)

    tile_probs, dir_probs, state_value = actor_critic_forward(x, params)
    jax.block_until_ready((tile_probs, dir_probs, state_value))

    # sanity check against pure-JAX reference
    rt, rd, rv = reference_forward(x, params)
    assert jnp.allclose(tile_probs, rt, atol=2e-3), "tile_probs mismatch"
    assert jnp.allclose(dir_probs, rd, atol=2e-3), "dir_probs mismatch"
    assert jnp.allclose(state_value, rv, atol=2e-3), "state_value mismatch"
    # exact-division softmax: rows sum to 1 at f32 precision
    assert bool(jnp.all(jnp.abs(jnp.sum(tile_probs, -1) - 1.0) < 1e-3))
    assert bool(jnp.all(jnp.abs(jnp.sum(dir_probs, -1) - 1.0) < 1e-3))
    assert tile_probs.shape == (B, num_tiles)
    assert dir_probs.shape == (B, num_directions)
    assert state_value.shape == (B, 1)

    print("KERNEL_OK")
</pallas_src>

<mosaic_0001>
module attributes {stable_mosaic.version = 11 : i64} {
  func.func @actor_critic_kernel(%arg0: i32, %arg1: memref<8x32xf32, #tpu.memory_space<vmem>>, %arg2: memref<32x128xbf16, #tpu.memory_space<vmem>>, %arg3: memref<3x128xf32, #tpu.memory_space<vmem>>, %arg4: memref<128x128xbf16, #tpu.memory_space<vmem>>, %arg5: memref<3x128xf32, #tpu.memory_space<vmem>>, %arg6: memref<128x128xbf16, #tpu.memory_space<vmem>>, %arg7: memref<1x128xf32, #tpu.memory_space<vmem>>, %arg8: memref<8x128xf32, #tpu.memory_space<vmem>>) attributes {dimension_semantics = [#tpu.dimension_semantics<parallel>], iteration_bounds = array<i64: 1>, scalar_prefetch = 0 : i64, scratch_operands = 0 : i64, tpu.core_type = #tpu.core_type<tc>, window_params = [{transform_indices = @transform_0, window_bounds = array<i64: 8, 32>}, {pipeline_mode = #tpu.pipeline_mode<synchronous>, transform_indices = @transform_1, window_bounds = array<i64: 32, 128>}, {pipeline_mode = #tpu.pipeline_mode<synchronous>, transform_indices = @transform_2, window_bounds = array<i64: 3, 128>}, {pipeline_mode = #tpu.pipeline_mode<synchronous>, transform_indices = @transform_3, window_bounds = array<i64: 128, 128>}, {pipeline_mode = #tpu.pipeline_mode<synchronous>, transform_indices = @transform_4, window_bounds = array<i64: 3, 128>}, {pipeline_mode = #tpu.pipeline_mode<synchronous>, transform_indices = @transform_5, window_bounds = array<i64: 128, 128>}, {pipeline_mode = #tpu.pipeline_mode<synchronous>, transform_indices = @transform_6, window_bounds = array<i64: 1, 128>}, {transform_indices = @transform_7, window_bounds = array<i64: 8, 128>}]} {
    %c0 = arith.constant 0 : index
    %c0_0 = arith.constant 0 : index
    %0 = vector.load %arg3[%c0, %c0_0] : memref<3x128xf32, #tpu.memory_space<vmem>>, vector<3x128xf32>
    %c0_1 = arith.constant 0 : index
    %c0_2 = arith.constant 0 : index
    %1 = vector.load %arg5[%c0_1, %c0_2] : memref<3x128xf32, #tpu.memory_space<vmem>>, vector<3x128xf32>
    %c0_3 = arith.constant 0 : index
    %c0_4 = arith.constant 0 : index
    %2 = vector.load %arg1[%c0_3, %c0_4] : memref<8x32xf32, #tpu.memory_space<vmem>>, vector<8x32xf32>
    %3 = arith.truncf %2 : vector<8x32xf32> to vector<8x32xbf16>
    %c0_5 = arith.constant 0 : index
    %c0_6 = arith.constant 0 : index
    %4 = vector.load %arg2[%c0_5, %c0_6] : memref<32x128xbf16, #tpu.memory_space<vmem>>, vector<32x128xbf16>
    %cst = arith.constant dense<0.000000e+00> : vector<8x128xf32>
    %5 = tpu.matmul %3, %4, %cst {dimension_numbers = #tpu.dot_dimension_numbers<[1], [0], [0], [1], [0, 0, 1, 1], [], []>} : vector<8x32xbf16>, vector<32x128xbf16>, vector<8x128xf32> -> vector<8x128xf32>
    %6 = vector.extract_strided_slice %0 {offsets = [0, 0], sizes = [1, 128], strides = [1, 1]} : vector<3x128xf32> to vector<1x128xf32>
    %7 = vector.broadcast %6 : vector<1x128xf32> to vector<8x128xf32>
    %8 = arith.addf %5, %7 : vector<8x128xf32>
    %9 = vector.extract_strided_slice %0 {offsets = [1, 0], sizes = [1, 128], strides = [1, 1]} : vector<3x128xf32> to vector<1x128xf32>
    %10 = vector.extract_strided_slice %0 {offsets = [2, 0], sizes = [1, 128], strides = [1, 1]} : vector<3x128xf32> to vector<1x128xf32>
    %cst_7 = arith.constant dense<0.000000e+00> : vector<8xf32>
    %11 = vector.multi_reduction <add>, %8, %cst_7 [1] : vector<8x128xf32> to vector<8xf32>
    %12 = vector.shape_cast %11 : vector<8xf32> to vector<8x1xf32>
    %cst_8 = arith.constant 1.280000e+02 : f32
    %13 = vector.broadcast %cst_8 : f32 to vector<8x1xf32>
    %14 = arith.divf %12, %13 : vector<8x1xf32>
    %15 = vector.broadcast %14 : vector<8x1xf32> to vector<8x128xf32>
    %16 = arith.subf %8, %15 : vector<8x128xf32>
    %17 = arith.mulf %16, %16 : vector<8x128xf32>
    %cst_9 = arith.constant dense<0.000000e+00> : vector<8xf32>
    %18 = vector.multi_reduction <add>, %17, %cst_9 [1] : vector<8x128xf32> to vector<8xf32>
    %19 = vector.shape_cast %18 : vector<8xf32> to vector<8x1xf32>
    %cst_10 = arith.constant 1.280000e+02 : f32
    %20 = vector.broadcast %cst_10 : f32 to vector<8x1xf32>
    %21 = arith.divf %19, %20 : vector<8x1xf32>
    %cst_11 = arith.constant 9.99999974E-6 : f32
    %22 = vector.broadcast %cst_11 : f32 to vector<8x1xf32>
    %23 = arith.addf %21, %22 : vector<8x1xf32>
    %24 = math.rsqrt %23 : vector<8x1xf32>
    %25 = vector.broadcast %24 : vector<8x1xf32> to vector<8x128xf32>
    %26 = arith.mulf %16, %25 : vector<8x128xf32>
    %27 = vector.broadcast %9 : vector<1x128xf32> to vector<8x128xf32>
    %28 = arith.mulf %26, %27 : vector<8x128xf32>
    %29 = vector.broadcast %10 : vector<1x128xf32> to vector<8x128xf32>
    %30 = arith.addf %28, %29 : vector<8x128xf32>
    %cst_12 = arith.constant 0.000000e+00 : f32
    %31 = vector.broadcast %cst_12 : f32 to vector<8x128xf32>
    %32 = arith.maximumf %30, %31 : vector<8x128xf32>
    %33 = arith.truncf %32 : vector<8x128xf32> to vector<8x128xbf16>
    %c0_13 = arith.constant 0 : index
    %c0_14 = arith.constant 0 : index
    %34 = vector.load %arg4[%c0_13, %c0_14] : memref<128x128xbf16, #tpu.memory_space<vmem>>, vector<128x128xbf16>
    %cst_15 = arith.constant dense<0.000000e+00> : vector<8x128xf32>
    %35 = tpu.matmul %33, %34, %cst_15 {dimension_numbers = #tpu.dot_dimension_numbers<[1], [0], [0], [1], [0, 0, 1, 1], [], []>} : vector<8x128xbf16>, vector<128x128xbf16>, vector<8x128xf32> -> vector<8x128xf32>
    %36 = vector.extract_strided_slice %1 {offsets = [0, 0], sizes = [1, 128], strides = [1, 1]} : vector<3x128xf32> to vector<1x128xf32>
    %37 = vector.broadcast %36 : vector<1x128xf32> to vector<8x128xf32>
    %38 = arith.addf %35, %37 : vector<8x128xf32>
    %39 = vector.extract_strided_slice %1 {offsets = [1, 0], sizes = [1, 128], strides = [1, 1]} : vector<3x128xf32> to vector<1x128xf32>
    %40 = vector.extract_strided_slice %1 {offsets = [2, 0], sizes = [1, 128], strides = [1, 1]} : vector<3x128xf32> to vector<1x128xf32>
    %cst_16 = arith.constant dense<0.000000e+00> : vector<8xf32>
    %41 = vector.multi_reduction <add>, %38, %cst_16 [1] : vector<8x128xf32> to vector<8xf32>
    %42 = vector.shape_cast %41 : vector<8xf32> to vector<8x1xf32>
    %cst_17 = arith.constant 1.280000e+02 : f32
    %43 = vector.broadcast %cst_17 : f32 to vector<8x1xf32>
    %44 = arith.divf %42, %43 : vector<8x1xf32>
    %45 = vector.broadcast %44 : vector<8x1xf32> to vector<8x128xf32>
    %46 = arith.subf %38, %45 : vector<8x128xf32>
    %47 = arith.mulf %46, %46 : vector<8x128xf32>
    %cst_18 = arith.constant dense<0.000000e+00> : vector<8xf32>
    %48 = vector.multi_reduction <add>, %47, %cst_18 [1] : vector<8x128xf32> to vector<8xf32>
    %49 = vector.shape_cast %48 : vector<8xf32> to vector<8x1xf32>
    %cst_19 = arith.constant 1.280000e+02 : f32
    %50 = vector.broadcast %cst_19 : f32 to vector<8x1xf32>
    %51 = arith.divf %49, %50 : vector<8x1xf32>
    %cst_20 = arith.constant 9.99999974E-6 : f32
    %52 = vector.broadcast %cst_20 : f32 to vector<8x1xf32>
    %53 = arith.addf %51, %52 : vector<8x1xf32>
    %54 = math.rsqrt %53 : vector<8x1xf32>
    %55 = vector.broadcast %54 : vector<8x1xf32> to vector<8x128xf32>
    %56 = arith.mulf %46, %55 : vector<8x128xf32>
    %57 = vector.broadcast %39 : vector<1x128xf32> to vector<8x128xf32>
    %58 = arith.mulf %56, %57 : vector<8x128xf32>
    %59 = vector.broadcast %40 : vector<1x128xf32> to vector<8x128xf32>
    %60 = arith.addf %58, %59 : vector<8x128xf32>
    %cst_21 = arith.constant 0.000000e+00 : f32
    %61 = vector.broadcast %cst_21 : f32 to vector<8x128xf32>
    %62 = arith.maximumf %60, %61 : vector<8x128xf32>
    %63 = arith.truncf %62 : vector<8x128xf32> to vector<8x128xbf16>
    %c0_22 = arith.constant 0 : index
    %c0_23 = arith.constant 0 : index
    %64 = vector.load %arg6[%c0_22, %c0_23] : memref<128x128xbf16, #tpu.memory_space<vmem>>, vector<128x128xbf16>
    %cst_24 = arith.constant dense<0.000000e+00> : vector<8x128xf32>
    %65 = tpu.matmul %63, %64, %cst_24 {dimension_numbers = #tpu.dot_dimension_numbers<[1], [0], [0], [1], [0, 0, 1, 1], [], []>} : vector<8x128xbf16>, vector<128x128xbf16>, vector<8x128xf32> -> vector<8x128xf32>
    %c0_25 = arith.constant 0 : index
    %c0_26 = arith.constant 0 : index
    %66 = vector.load %arg7[%c0_25, %c0_26] : memref<1x128xf32, #tpu.memory_space<vmem>>, vector<1x128xf32>
    %67 = vector.broadcast %66 : vector<1x128xf32> to vector<8x128xf32>
    %68 = arith.addf %65, %67 : vector<8x128xf32>
    %69 = tpu.iota {dimensions = array<i32: 1>} : vector<8x128xi32>
    %c16_i32 = arith.constant 16 : i32
    %70 = vector.broadcast %c16_i32 : i32 to vector<8x128xi32>
    %71 = arith.cmpi slt, %69, %70 : vector<8x128xi32>
    %c16_i32_27 = arith.constant 16 : i32
    %72 = vector.broadcast %c16_i32_27 : i32 to vector<8x128xi32>
    %73 = arith.cmpi sge, %69, %72 : vector<8x128xi32>
    %c20_i32 = arith.constant 20 : i32
    %74 = vector.broadcast %c20_i32 : i32 to vector<8x128xi32>
    %75 = arith.cmpi slt, %69, %74 : vector<8x128xi32>
    %76 = arith.andi %73, %75 : vector<8x128xi1>
    %c20_i32_28 = arith.constant 20 : i32
    %77 = vector.broadcast %c20_i32_28 : i32 to vector<8x128xi32>
    %78 = arith.cmpi eq, %69, %77 : vector<8x128xi32>
    %cst_29 = arith.constant 0xFF800000 : f32
    %79 = vector.broadcast %cst_29 : f32 to vector<8x128xf32>
    %80 = arith.select %71, %68, %79 : vector<8x128xi1>, vector<8x128xf32>
    %cst_30 = arith.constant dense<0xFF800000> : vector<8xf32>
    %81 = vector.multi_reduction <maximumf>, %80, %cst_30 [1] : vector<8x128xf32> to vector<8xf32>
    %82 = vector.shape_cast %81 : vector<8xf32> to vector<8x1xf32>
    %cst_31 = arith.constant 0xFF800000 : f32
    %83 = vector.broadcast %cst_31 : f32 to vector<8x128xf32>
    %84 = arith.select %76, %68, %83 : vector<8x128xi1>, vector<8x128xf32>
    %cst_32 = arith.constant dense<0xFF800000> : vector<8xf32>
    %85 = vector.multi_reduction <maximumf>, %84, %cst_32 [1] : vector<8x128xf32> to vector<8xf32>
    %86 = vector.shape_cast %85 : vector<8xf32> to vector<8x1xf32>
    %87 = vector.shape_cast %86 : vector<8x1xf32> to vector<8x1xf32>
    %88 = vector.broadcast %87 : vector<8x1xf32> to vector<8x128xf32>
    %89 = arith.select %76, %88, %68 : vector<8x128xi1>, vector<8x128xf32>
    %90 = vector.shape_cast %82 : vector<8x1xf32> to vector<8x1xf32>
    %91 = vector.broadcast %90 : vector<8x1xf32> to vector<8x128xf32>
    %92 = arith.select %71, %91, %89 : vector<8x128xi1>, vector<8x128xf32>
    %93 = arith.subf %68, %92 : vector<8x128xf32>
    %94 = math.exp %93 : vector<8x128xf32>
    %cst_33 = arith.constant 0.000000e+00 : f32
    %95 = vector.broadcast %cst_33 : f32 to vector<8x128xf32>
    %96 = arith.select %71, %94, %95 : vector<8x128xi1>, vector<8x128xf32>
    %cst_34 = arith.constant dense<0.000000e+00> : vector<8xf32>
    %97 = vector.multi_reduction <add>, %96, %cst_34 [1] : vector<8x128xf32> to vector<8xf32>
    %98 = vector.shape_cast %97 : vector<8xf32> to vector<8x1xf32>
    %cst_35 = arith.constant 0.000000e+00 : f32
    %99 = vector.broadcast %cst_35 : f32 to vector<8x128xf32>
    %100 = arith.select %76, %94, %99 : vector<8x128xi1>, vector<8x128xf32>
    %cst_36 = arith.constant dense<0.000000e+00> : vector<8xf32>
    %101 = vector.multi_reduction <add>, %100, %cst_36 [1] : vector<8x128xf32> to vector<8xf32>
    %102 = vector.shape_cast %101 : vector<8xf32> to vector<8x1xf32>
    %cst_37 = arith.constant 1.000000e+00 : f32
    %103 = vector.broadcast %cst_37 : f32 to vector<8x1xf32>
    %104 = arith.divf %103, %98 : vector<8x1xf32>
    %cst_38 = arith.constant 1.000000e+00 : f32
    %105 = vector.broadcast %cst_38 : f32 to vector<8x1xf32>
    %106 = arith.divf %105, %102 : vector<8x1xf32>
    %cst_39 = arith.constant 0.000000e+00 : f32
    %107 = vector.shape_cast %106 : vector<8x1xf32> to vector<8x1xf32>
    %108 = vector.broadcast %107 : vector<8x1xf32> to vector<8x128xf32>
    %109 = vector.broadcast %cst_39 : f32 to vector<8x128xf32>
    %110 = arith.select %76, %108, %109 : vector<8x128xi1>, vector<8x128xf32>
    %111 = vector.shape_cast %104 : vector<8x1xf32> to vector<8x1xf32>
    %112 = vector.broadcast %111 : vector<8x1xf32> to vector<8x128xf32>
    %113 = arith.select %71, %112, %110 : vector<8x128xi1>, vector<8x128xf32>
    %114 = arith.mulf %94, %113 : vector<8x128xf32>
    %115 = arith.select %78, %68, %114 : vector<8x128xi1>, vector<8x128xf32>
    %c0_40 = arith.constant 0 : index
    %c0_41 = arith.constant 0 : index
    %116 = vector.load %arg8[%c0_40, %c0_41] : memref<8x128xf32, #tpu.memory_space<vmem>>, vector<8x128xf32>
    tpu.vector_store %arg8[%c0_40, %c0_41], %115 {strides = array<i32>} : memref<8x128xf32, #tpu.memory_space<vmem>>, vector<8x128xf32>,
    return
  }
  func.func @transform_0(%arg0: i32) -> (i32, i32) {
    %c0_i32 = arith.constant 0 : i32
    %c0_i32_0 = arith.constant 0 : i32
    return %arg0, %c0_i32 : i32, i32
  }
  func.func @transform_1(%arg0: i32) -> (i32, i32) {
    %c0_i32 = arith.constant 0 : i32
    %c0_i32_0 = arith.constant 0 : i32
    %c0_i32_1 = arith.constant 0 : i32
    return %c0_i32, %c0_i32_0 : i32, i32
  }
  func.func @transform_2(%arg0: i32) -> (i32, i32) {
    %c0_i32 = arith.constant 0 : i32
    %c0_i32_0 = arith.constant 0 : i32
    %c0_i32_1 = arith.constant 0 : i32
    return %c0_i32, %c0_i32_0 : i32, i32
  }
  func.func @transform_3(%arg0: i32) -> (i32, i32) {
    %c0_i32 = arith.constant 0 : i32
    %c0_i32_0 = arith.constant 0 : i32
    %c0_i32_1 = arith.constant 0 : i32
    return %c0_i32, %c0_i32_0 : i32, i32
  }
  func.func @transform_4(%arg0: i32) -> (i32, i32) {
    %c0_i32 = arith.constant 0 : i32
    %c0_i32_0 = arith.constant 0 : i32
    %c0_i32_1 = arith.constant 0 : i32
    return %c0_i32, %c0_i32_0 : i32, i32
  }
  func.func @transform_5(%arg0: i32) -> (i32, i32) {
    %c0_i32 = arith.constant 0 : i32
    %c0_i32_0 = arith.constant 0 : i32
    %c0_i32_1 = arith.constant 0 : i32
    return %c0_i32, %c0_i32_0 : i32, i32
  }
  func.func @transform_6(%arg0: i32) -> (i32, i32) {
    %c0_i32 = arith.constant 0 : i32
    %c0_i32_0 = arith.constant 0 : i32
    %c0_i32_1 = arith.constant 0 : i32
    return %c0_i32, %c0_i32_0 : i32, i32
  }
  func.func @transform_7(%arg0: i32) -> (i32, i32) {
    %c0_i32 = arith.constant 0 : i32
    %c0_i32_0 = arith.constant 0 : i32
    return %arg0, %c0_i32 : i32, i32
  }
}

</mosaic_0001>

<bundles_post_ra>
// kernel: tpu_custom_call.1
= control target key start
LH: loop header
LB: loop body
LE: loop exit
PB: predicated region body
PF: predicated region fallthrough
CT: control target
= control target key end

     0   :  { %12 = vsyncpa [#allocation3], 0  ;;  %s880_s0 = inlined_call_operand.hbm [shape: f32[8,32], index: 0, kind: input, shape index: {}]   ;;  %s881_s1 = inlined_call_operand.hbm [shape: bf16[32,128], index: 1, kind: input, shape index: {}]   ;;  %s882_s2 = inlined_call_operand.vmem [shape: f32[3,128], index: 2, kind: input, shape index: {}]   ;;  %s883_s3 = inlined_call_operand.hbm [shape: bf16[128,128], index: 3, kind: input, shape index: {}]   ;;  %s884_s4 = inlined_call_operand.vmem [shape: f32[3,128], index: 4, kind: input, shape index: {}]   ;;  %s885_s5 = inlined_call_operand.hbm [shape: bf16[128,128], index: 5, kind: input, shape index: {}]   ;;  %s886_s6 = inlined_call_operand.vmem [shape: f32[1,128], index: 6, kind: input, shape index: {}]   ;;  %s887_s7 = inlined_call_operand.hbm [shape: f32[8,128], index: 7, kind: output, shape index: {}]  }
   0x1   :  { %13 = vsyncpa [#allocation6], 0 }
   0x2   :  { %14 = vsyncpa [#allocation9], 0 }
   0x3   :  { %15 = vsyncpa [#allocation4], 0  ;;  %s709_s24 = smov [#allocation5]   ;;  %s591_s28 = scalar_lea.hbm %s881_s1, 256 }
   0x4   :  { %s31_s25 = sshll.u32 %s709_s24, 4  ;;  %p592_p0 = scmp.ne.s32.totalorder %s881_s1, %s591_s28  ;;  %s32_s25 = int_to_ptr.vmem [resolvable:$true] %s31_s25 }
   0x5   :  { %p595_p1 = scmp.lt.u32.totalorder %s591_s28, %s881_s1 }
   0x7   :  { %p597_p2 = pnand %p595_p1, %p592_p0 }
   0x9   :  { %600 = shalt.err (!%p597_p2)
}
   0xa   :  { %s601_s10 = scalar_lea.vmem %s32_s25, 256  ;;  %p606_p4 = scmp.lt.s32.totalorder %s32_s25, %s32_s25 }
   0xb   :  { %p602_p3 = scmp.ne.s32.totalorder %s32_s25, %s601_s10  ;;  %p607_p5 = scmp.lt.s32.totalorder %s601_s10, %s601_s10 }
   0xd   :  { %p608_p6 = por %p607_p5, %p606_p4 }
   0xf   :  { %p609_p7 = pnand %p608_p6, %p602_p3 }
  0x11   :  { %612 = shalt.err (!%p609_p7)
}
  0x12   :  { %s710_s11 = smov 64   ;;  %s711_s12 = smov 4  }
  0x13   :  { %37 = dma.hbm_to_vmem [thread:$0]  %s881_s1, 256, %s32_s25, [#allocation6], %s710_s11, %s710_s11, %s711_s12  }
  0x14   :  { %s712_s15 = smov [#allocation2]   ;;  %s713_s17 = smov [#allocation7]  }
  0x15   :  { %s22_s16 = sshll.u32 %s712_s15, 4  ;;  %s45_s18 = sshll.u32 %s713_s17, 4  ;;  %s23_s16 = int_to_ptr.vmem [resolvable:$true] %s22_s16  ;;  %s46_s18 = int_to_ptr.vmem [resolvable:$true] %s45_s18 }
  0x16   :  { %s613_s21 = scalar_lea.hbm %s880_s0, 128 }
  0x17   :  { %p614_p8 = scmp.ne.s32.totalorder %s880_s0, %s613_s21  ;;  %p617_p9 = scmp.lt.u32.totalorder %s613_s21, %s880_s0 }
  0x19   :  { %p619_p10 = pnand %p617_p9, %p614_p8 }
  0x1b   :  { %622 = shalt.err (!%p619_p10)
}
  0x1c   :  { %s623_s1 = scalar_lea.vmem %s23_s16, 128  ;;  %p628_p12 = scmp.lt.s32.totalorder %s23_s16, %s23_s16 }
  0x1d   :  { %p624_p11 = scmp.ne.s32.totalorder %s23_s16, %s623_s1  ;;  %p629_p13 = scmp.lt.s32.totalorder %s623_s1, %s623_s1 }
  0x1f   :  { %p630_p0 = por %p629_p13, %p628_p12 }
  0x21   :  { %p631_p1 = pnand %p630_p0, %p624_p11 }
  0x23   :  { %634 = shalt.err (!%p631_p1)
}
  0x24   :  { %25 = dma.hbm_to_vmem [thread:$0]  %s880_s0, 128, %s23_s16, [#allocation3]  }
  0x25   :  { %s635_s30 = scalar_lea.hbm %s883_s3, 1024 }
  0x26   :  { %p636_p2 = scmp.ne.s32.totalorder %s883_s3, %s635_s30  ;;  %p639_p3 = scmp.lt.u32.totalorder %s635_s30, %s883_s3 }
  0x28   :  { %p641_p4 = pnand %p639_p3, %p636_p2 }
  0x2a   :  { %644 = shalt.err (!%p641_p4)
}
  0x2b   :  { %s645_s14 = scalar_lea.vmem %s46_s18, 1024  ;;  %p650_p6 = scmp.lt.s32.totalorder %s46_s18, %s46_s18 }
  0x2c   :  { %p646_p5 = scmp.ne.s32.totalorder %s46_s18, %s645_s14  ;;  %p651_p7 = scmp.lt.s32.totalorder %s645_s14, %s645_s14 }
  0x2e   :  { %p652_p8 = por %p651_p7, %p650_p6 }
  0x30   :  { %p653_p9 = pnand %p652_p8, %p646_p5 }
  0x32   :  { %656 = shalt.err (!%p653_p9)
}
  0x33   :  { %51 = dma.hbm_to_vmem [thread:$0]  %s883_s3, 1024, %s46_s18, [#allocation6], %s710_s11, %s710_s11, %s711_s12  }
  0x34   :  { %s714_s16 = smov [#allocation8]   ;;  %s657_s21 = scalar_lea.hbm %s885_s5, 1024 }
  0x35   :  { %s59_s17 = sshll.u32 %s714_s16, 4  ;;  %p658_p10 = scmp.ne.s32.totalorder %s885_s5, %s657_s21  ;;  %s60_s17 = int_to_ptr.vmem [resolvable:$true] %s59_s17 }
  0x36   :  { %p661_p11 = scmp.lt.u32.totalorder %s657_s21, %s885_s5 }
  0x38   :  { %p663_p12 = pnand %p661_p11, %p658_p10 }
  0x3a   :  { %666 = shalt.err (!%p663_p12)
}
  0x3b   :  { %s667_s1 = scalar_lea.vmem %s60_s17, 1024  ;;  %p672_p0 = scmp.lt.s32.totalorder %s60_s17, %s60_s17 }
  0x3c   :  { %p668_p13 = scmp.ne.s32.totalorder %s60_s17, %s667_s1  ;;  %p673_p1 = scmp.lt.s32.totalorder %s667_s1, %s667_s1 }
  0x3e   :  { %p674_p2 = por %p673_p1, %p672_p0 }
  0x40   :  { %p675_p3 = pnand %p674_p2, %p668_p13 }
  0x42   :  { %678 = shalt.err (!%p675_p3)
}
  0x43   :  { %65 = dma.hbm_to_vmem [thread:$0]  %s885_s5, 1024, %s60_s17, [#allocation9], %s710_s11, %s710_s11, %s711_s12  }
  0x44   :  { %701 = dma.done.wait [#allocation3], 128  }
  0x45   :  { %702 = vsyncadd [#allocation3], 4294967168 }
  0x46   :  { %703 = dma.done.wait [#allocation6], 1280  }
  0x47   :  { %704 = vsyncadd [#allocation6], 4294966016 }
  0x48   :  { %705 = dma.done.wait [#allocation9], 1024  }
  0x49   :  { %706 = vsyncadd [#allocation9], 4294966272  ;;  %v715_v0 = vmov 0.0   ;;  %vm716_vm0 = vmmov 0   ;;  %v563_v1 = vld [vmem:[#allocation5] sm:$0xff]   ;;  %v564_v2 = vld [vmem:[#allocation5 + $0x8] sm:$0xff]   ;;  %v89_v5 = vlaneseq }
  0x4a   :  { %506 = vmatprep.subr.bf16.mxu0 %v715_v0  ;;  %510 = vmatprep.mubr.msk.bf16.mxu0 %vm716_vm0, %v715_v0  ;;  %v83_v3 = vld [vmem:[#allocation2] sm:$0xff]  ;;  %vm105_vm1 = vcmask 261120   ;;  %v565_v15 = vld [vmem:[#allocation7] sm:$0xff]   ;;  %v567_v21 = vld [vmem:[#allocation7 + $0x10] sm:$0xff]  }
  0x4b   :  { %514 = vmatprep.subr.bf16.mxu1 %v715_v0  ;;  %530 = vmatprep.mubr.msk.bf16.mxu1 %vm716_vm0, %v715_v0  ;;  %v84_v4 = vpack.c.bf16 %v83_v3, %v83_v3  ;;  %v823_v6 = vshrl.u32 %v89_v5, 7  ;;  %v81_v8 = vld [vmem:[%s882_s2] sm:$0x7]  ;;  %v568_v22 = vld [vmem:[#allocation7 + $0x18] sm:$0xff]   ;;  %v569_v23 = vld [vmem:[#allocation7 + $0x20] sm:$0xff]  }
  0x4c   :  { %507 = vmatpush3.bf16.msra.mxu0 %v563_v1  ;;  %515 = vmatpush3.bf16.msra.mxu1 %v565_v15  ;;  %v566_v16 = vld [vmem:[#allocation7 + $0x8] sm:$0xff]   ;;  %v571_v25 = vld [vmem:[#allocation7 + $0x30] sm:$0xff]   ;;  %v572_v26 = vld [vmem:[#allocation7 + $0x38] sm:$0xff]  }
  0x4d   :  { %508 = vmatprep.subr.bf16.mxu0 %v715_v0  ;;  %v91_v7 = vsub.s32 0, %v823_v6  ;;  %516 = vmatprep.subr.bf16.mxu1 %v715_v0  ;;  %v570_v24 = vld [vmem:[#allocation7 + $0x28] sm:$0xff]   ;;  %v163_v30 = vsub.s32 1, %v823_v6  ;;  %v168_v31 = vsub.s32 2, %v823_v6  ;;  %v573_v47 = vld [vmem:[#allocation8] sm:$0xff]   ;;  %v575_v53 = vld [vmem:[#allocation8 + $0x10] sm:$0xff]  }
  0x4e   :  { %v82_v40 = vld [vmem:[%s884_s4] sm:$0x7]  ;;  %v576_v54 = vld [vmem:[#allocation8 + $0x18] sm:$0xff]   ;;  %v577_v55 = vld [vmem:[#allocation8 + $0x20] sm:$0xff]  }
  0x4f   :  { %v92_v9 = vrot.slane %v81_v8, %v91_v7  ;;  %v164_v32 = vrot.slane %v81_v8, %v163_v30  ;;  %v169_v35 = vrot.slane %v81_v8, %v168_v31  ;;  %v192_v41 = vrot.slane %v82_v40, %v91_v7  ;;  %v574_v48 = vld [vmem:[#allocation8 + $0x8] sm:$0xff]   ;;  %v579_v57 = vld [vmem:[#allocation8 + $0x30] sm:$0xff]   ;;  %v580_v58 = vld [vmem:[#allocation8 + $0x38] sm:$0xff]  }
  0x50   :  { %509 = vmatpush3.bf16.msra.mxu0 %v564_v2  ;;  %517 = vmatpush3.bf16.msra.mxu1 %v566_v16  ;;  %v578_v56 = vld [vmem:[#allocation8 + $0x28] sm:$0xff]   ;;  %v295_v62 = vrot.slane %v82_v40, %v163_v30  ;;  %v300_v1 = vrot.slane %v82_v40, %v168_v31  ;;  %v416_v8 = vand.u32 127, %v89_v5 }
  0x51   :  { %534 = vmatprep.subr.bf16.mxu0 %v715_v0  ;;  %518 = vmatprep.subr.bf16.mxu1 %v715_v0 }
  0x52   :  { %vm418_vm2 = vcmp.ge.s32.totalorder %v416_v8, 16  ;;  %vm419_vm3 = vcmp.lt.s32.totalorder %v416_v8, 20  ;;  %vm417_vm5 = vcmp.lt.s32.totalorder %v416_v8, 16  ;;  %vm421_vm6 = vcmp.eq.s32.totalorder %v416_v8, 20 }
  0x53   :  { %511 = vmatmul.mubr.msk.bf16.vlgmr.msra.gmra.mrb[0].mxu0 %vm105_vm1, %v84_v4  ;;  %vm852_vm4 = vmand %vm418_vm2, %vm419_vm3 }
  0x54   :  { %550 = vmatprep.mubr.msk.bf16.mxu0 %vm716_vm0, %v715_v0  ;;  %519 = vmatpush3.bf16.msra.mxu1 %v567_v21 }
  0x55   :  { %520 = vmatprep.subr.bf16.mxu1 %v715_v0  ;;  %535 = vmatpush3.bf16.msra.mxu0 %v573_v47 }
  0x56   :  { %536 = vmatprep.subr.bf16.mxu0 %v715_v0 }
  0x58   :  { %521 = vmatpush3.bf16.msra.mxu1 %v568_v22 }
  0x59   :  { %522 = vmatprep.subr.bf16.mxu1 %v715_v0  ;;  %537 = vmatpush3.bf16.msra.mxu0 %v574_v48 }
  0x5a   :  { %538 = vmatprep.subr.bf16.mxu0 %v715_v0 }
  0x5c   :  { %523 = vmatpush3.bf16.msra.mxu1 %v569_v23 }
  0x5d   :  { %524 = vmatprep.subr.bf16.mxu1 %v715_v0  ;;  %539 = vmatpush3.bf16.msra.mxu0 %v575_v53 }
  0x5e   :  { %540 = vmatprep.subr.bf16.mxu0 %v715_v0 }
  0x60   :  { %525 = vmatpush3.bf16.msra.mxu1 %v570_v24 }
  0x61   :  { %526 = vmatprep.subr.bf16.mxu1 %v715_v0  ;;  %541 = vmatpush3.bf16.msra.mxu0 %v576_v54 }
  0x62   :  { %542 = vmatprep.subr.bf16.mxu0 %v715_v0 }
  0x64   :  { %527 = vmatpush3.bf16.msra.mxu1 %v571_v25 }
  0x65   :  { %528 = vmatprep.subr.bf16.mxu1 %v715_v0  ;;  %543 = vmatpush3.bf16.msra.mxu0 %v577_v55 }
  0x66   :  { %544 = vmatprep.subr.bf16.mxu0 %v715_v0 }
  0x68   :  { %529 = vmatpush3.bf16.msra.mxu1 %v572_v26 }
  0x69   :  { %545 = vmatpush3.bf16.msra.mxu0 %v578_v56 }
  0x6a   :  { %546 = vmatprep.subr.bf16.mxu0 %v715_v0 }
  0x6d   :  { %547 = vmatpush3.bf16.msra.mxu0 %v579_v57 }
  0x6e   :  { %548 = vmatprep.subr.bf16.mxu0 %v715_v0  ;;  %v476_v0 = vld [vmem:[%s886_s6] ss:$0 sm:$0xff]  ;;  %s717_s6 = smov [#allocation10]  }
  0x6f   :  { %s454_s27 = sshll.u32 %s717_s6, 4  ;;  %s455_s27 = int_to_ptr.vmem [resolvable:$true] %s454_s27 }
  0x70   :  { %s679_s28 = scalar_lea.vmem %s455_s27, 128  ;;  %p684_p5 = scmp.lt.s32.totalorder %s455_s27, %s455_s27 }
  0x71   :  { %549 = vmatpush3.bf16.msra.mxu0 %v580_v58  ;;  %p680_p4 = scmp.ne.s32.totalorder %s455_s27, %s679_s28  ;;  %p685_p6 = scmp.lt.s32.totalorder %s679_s28, %s679_s28 }
  0x73   :  { %p686_p7 = por %p685_p6, %p684_p5 }
  0x75   :  { %p687_p8 = pnand %p686_p7, %p680_p4 }
 0x126   :  { %v143_v10 = vpop.f32.mrb[0].mxu0 }
 0x127   :  { %v144_v11 = vadd.f32 %v143_v10, %v92_v9  ;;  %v512_v12 = vpop.f32.mrb[1].mxu0 }
 0x128   :  { %v146_v13 = vpop.f32.mrb[2].mxu0 }
 0x129   :  { %v513_v14 = vpop.f32.mrb[3].mxu0  ;;  %149 = vadd.xlane.f32.xlu0 %v144_v11 }
 0x1b6   :  { %v150_v17 = vpop.xlane.xlu0 %149 }
 0x1b7   :  { %v152_v18 = vmul.f32 0.0078125, %v150_v17 }
 0x1b9   :  { %v153_v19 = vsub.f32 %v144_v11, %v152_v18 }
 0x1bb   :  { %v154_v20 = vmul.f32 %v153_v19, %v153_v19 }
 0x1bd   :  { %155 = vadd.xlane.f32.xlu0 %v154_v20 }
 0x24a   :  { %v156_v27 = vpop.xlane.xlu0 %155 }
 0x24b   :  { %v157_v28 = vmul.f32 0.0078125, %v156_v27 }
 0x24d   :  { %v158_v29 = vadd.f32 1e-05, %v157_v28 }
 0x24f   :  { %581 = vrsqrt.f32 %v158_v29 }
 0x259   :  { %v582_v33 = vpop.eup %581 }
 0x25a   :  { %v160_v34 = vmul.f32 %v582_v33, %v153_v19 }
 0x25c   :  { %v165_v36 = vmul.f32 %v164_v32, %v160_v34 }
 0x25e   :  { %v170_v37 = vadd.f32 %v169_v35, %v165_v36 }
 0x260   :  { %v171_v38 = vmax.f32 %v170_v37, 0.0 }
 0x262   :  { %v172_v39 = vpack.c.bf16 %v171_v38, %v171_v38 }
 0x264   :  { %531 = vmatmul.mubr.bf16.vlgmr.msra.gmra.mrb[0].mxu1 %v172_v39 }
 0x337   :  { %v275_v42 = vpop.f32.mrb[0].mxu1 }
 0x338   :  { %v276_v43 = vadd.f32 %v275_v42, %v192_v41  ;;  %v532_v44 = vpop.f32.mrb[1].mxu1 }
 0x339   :  { %v278_v45 = vpop.f32.mrb[2].mxu1 }
 0x33a   :  { %281 = vadd.xlane.f32.xlu1 %v276_v43  ;;  %v533_v46 = vpop.f32.mrb[3].mxu1 }
 0x3c7   :  { %v282_v49 = vpop.xlane.xlu1 %281 }
 0x3c8   :  { %v283_v50 = vmul.f32 0.0078125, %v282_v49 }
 0x3ca   :  { %v284_v51 = vsub.f32 %v276_v43, %v283_v50 }
 0x3cc   :  { %v285_v52 = vmul.f32 %v284_v51, %v284_v51 }
 0x3ce   :  { %286 = vadd.xlane.f32.xlu1 %v285_v52 }
 0x45b   :  { %v287_v59 = vpop.xlane.xlu1 %286 }
 0x45c   :  { %v288_v60 = vmul.f32 0.0078125, %v287_v59 }
 0x45e   :  { %v289_v61 = vadd.f32 1e-05, %v288_v60 }
 0x460   :  { %583 = vrsqrt.f32 %v289_v61 }
 0x46a   :  { %v584_v63 = vpop.eup %583 }
 0x46b   :  { %v291_v2 = vmul.f32 %v584_v63, %v284_v51 }
 0x46d   :  { %v296_v3 = vmul.f32 %v295_v62, %v291_v2 }
 0x46f   :  { %v301_v4 = vadd.f32 %v300_v1, %v296_v3 }
 0x471   :  { %v302_v6 = vmax.f32 %v301_v4, 0.0 }
 0x473   :  { %v303_v7 = vpack.c.bf16 %v302_v6, %v302_v6 }
 0x475   :  { %551 = vmatmul.mubr.bf16.vlgmr.msra.gmra.mrb[4].mxu0 %v303_v7 }
 0x548   :  { %v409_v9 = vpop.f32.mrb[4].mxu0 }
 0x549   :  { %v410_v11 = vadd.f32 %v476_v0, %v409_v9  ;;  %v552_v12 = vpop.f32.mrb[5].mxu0 }
 0x54a   :  { %v412_v13 = vpop.f32.mrb[6].mxu0 }
 0x54b   :  { %v553_v14 = vpop.f32.mrb[7].mxu0  ;;  %v425_v15 = vsel %vm852_vm4, %v410_v11, -inf  ;;  %v422_v5 = vsel %vm417_vm5, %v410_v11, -inf }
 0x54c   :  { %426 = vmax.xlane.f32.xlu0 %v425_v15  ;;  %423 = vmax.xlane.f32.xlu1 %v422_v5 }
 0x5d9   :  { %v427_v16 = vpop.xlane.xlu0 %426  ;;  %v424_v17 = vpop.xlane.xlu1 %423 }
 0x5da   :  { %v428_v18 = vsel %vm852_vm4, %v427_v16, %v410_v11 }
 0x5db   :  { %v429_v19 = vsel %vm417_vm5, %v424_v17, %v428_v18 }
 0x5dc   :  { %v430_v20 = vsub.f32 %v410_v11, %v429_v19 }
 0x5de   :  { %v431_v21 = vmul.f32 1.442695, %v430_v20 }
 0x5e0   :  { %585 = vpow2.f32 %v431_v21 }
 0x5ea   :  { %v586_v22 = vpop.eup %585 }
 0x5eb   :  { %v436_v23 = vsel %vm852_vm4, %v586_v22, 0.0  ;;  %v433_v24 = vsel %vm417_vm5, %v586_v22, 0.0 }
 0x5ec   :  { %437 = vadd.xlane.f32.xlu0 %v436_v23  ;;  %434 = vadd.xlane.f32.xlu1 %v433_v24 }
 0x679   :  { %v438_v25 = vpop.xlane.xlu0 %437  ;;  %v435_v26 = vpop.xlane.xlu1 %434 }
 0x67a   :  { %587 = vrcp.f32 %v438_v25 }
 0x67b   :  { %589 = vrcp.f32 %v435_v26 }
 0x684   :  { %v588_v27 = vpop.eup %587 }
 0x685   :  { %v590_v28 = vpop.eup %589  ;;  %v443_v29 = vsel %vm852_vm4, %v588_v27, 0.0 }
 0x686   :  { %v444_v30 = vsel %vm417_vm5, %v590_v28, %v443_v29 }
 0x687   :  { %v445_v31 = vmul.f32 %v586_v22, %v444_v30 }
 0x689   :  { %v446_v32 = vsel %vm421_vm6, %v410_v11, %v445_v31 }
 0x68a   :  { %447 = vst [vmem:[#allocation10] sm:$0xff] %v446_v32 }
 0x68b   :  { %690 = shalt.err (!%p687_p8)
}
 0x68c   :  { %s691_s8 = scalar_lea.hbm %s887_s7, 128 }
 0x68d   :  { %p692_p9 = scmp.ne.s32.totalorder %s887_s7, %s691_s8  ;;  %p695_p10 = scmp.lt.u32.totalorder %s691_s8, %s887_s7 }
 0x68f   :  { %p697_p11 = pnand %p695_p10, %p692_p9 }
 0x691   :  { %700 = shalt.err (!%p697_p11)
}
 0x692   :  { %457 = dma.vmem_to_hbm [thread:$0]  %s455_s27, 128, %s887_s7, [#allocation4]  }
 0x693   :  { %707 = dma.done.wait [#allocation4], 128  }
 0x694   :  { %708 = vsyncadd [#allocation4], 4294967168 }
 0x695   :  { %461 = vsyncpa [#allocation3], 1 }
 0x696   :  { %462 = vsyncpa [#allocation6], 1 }
 0x697   :  { %463 = vsyncpa [#allocation9], 1 }
 0x698   :  { %464 = vsyncpa [#allocation4], 1 }

</bundles_post_ra>
